<compile_context>
chip_gen: v7x
topology: tpu7x:2x2x1
jax: 0.10.0
libtpu: 0.0.40
codegen_flags: <defaults>
</compile_context>

<pallas_src>
import functools
import math

import jax
import jax.numpy as jnp
import numpy as np
from jax.experimental import pallas as pl
from jax.experimental.pallas import tpu as pltpu


# ----------------------------- Pallas kernel ------------------------------- #
def _pe_kernel(scale_ref, base_ref, o_ref, *, tile_rows):
    """Writes one (tile_rows, L) lane-dense slab: sin(row * scale + base).

    `scale`/`base` are per-column constants folding the inverse frequency, the
    even/odd cos->sin phase (+pi/2) and the intra-row position offset of the
    flattened layout, so the per-element work is one FMA + one sin.
    """
    i = pl.program_id(0)
    L = o_ref.shape[-1]
    row = (jax.lax.broadcasted_iota(jnp.int32, (tile_rows, L), 0)
           + i * tile_rows).astype(jnp.float32)
    angle = row * scale_ref[...] + base_ref[...]          # (tile_rows,L)*(1,L)+(1,L)
    o_ref[...] = jnp.sin(angle).astype(o_ref.dtype)


# ------------------------------ Python wrapper ------------------------------ #
def _round_up(v, m):
    return ((v + m - 1) // m) * m


def positional_encoding(x, dims, max_len=5000, dtype=jnp.float32):
    """Equivalent of PositionalEncoding.forward(x): returns (1, x.shape[1], dims)."""
    seq_len = int(x.shape[1])
    assert 0 < seq_len <= max_len, "sequence length exceeds max_len"
    assert dims % 2 == 0, "dims must be even (matches the PyTorch module)"

    # ---- host-side per-column constants (hoisted out of the kernel) -------
    col = np.arange(dims)
    inv_freq = np.exp((2.0 * (col // 2)) * -(math.log(10000.0) / dims))   # (dims,)
    phase = np.where(col % 2 == 0, 0.0, np.pi / 2.0)                      # cos=sin(+pi/2)

    # ---- lane-dense flattened layout: rows of width L (multiple of 128) ----
    if dims % 128 == 0:
        L = dims
    else:
        L = dims * 128 // math.gcd(dims, 128)                 # lcm(dims, 128)
        if L > 4096 or (seq_len * dims) % L != 0:
            L = dims                                          # fallback (masked stores)
    k = L // dims                                             # positions per flat row
    rows_total = (seq_len * dims) // L

    lane = np.arange(L)
    inv_freq_row = inv_freq[lane % dims]
    scale_row = (k * inv_freq_row).astype(np.float32).reshape(1, L)
    base_row = ((lane // dims) * inv_freq_row
                + phase[lane % dims]).astype(np.float32).reshape(1, L)

    # ---- row-tile selection -------------------------------------------------
    if rows_total <= 8:
        tile_rows = rows_total                                # single full-extent block
    else:
        bytes_per_row = L * 4
        vmem_rows = max(8, ((4 << 20) // bytes_per_row) // 8 * 8)   # <=4 MiB / buffer
        tile_rows = min(2048, vmem_rows)
        # Ensure grid >= 2 when possible so v7x megacore uses both TensorCores.
        tile_rows = min(tile_rows, _round_up(pl.cdiv(rows_total, 2), 8))
        tile_rows = max(8, tile_rows)
    grid = (pl.cdiv(rows_total, tile_rows),)

    pe_flat = pl.pallas_call(
        functools.partial(_pe_kernel, tile_rows=tile_rows),
        out_shape=jax.ShapeDtypeStruct((rows_total, L), dtype),
        grid=grid,
        in_specs=[pl.BlockSpec((1, L), lambda i: (0, 0)),
                  pl.BlockSpec((1, L), lambda i: (0, 0))],
        out_specs=pl.BlockSpec((tile_rows, L), lambda i: (i, 0)),
        compiler_params=pltpu.CompilerParams(dimension_semantics=("parallel",)),
    )(jnp.asarray(scale_row), jnp.asarray(base_row))

    # Row-major refold (pure metadata): (rows_total, L) -> (1, seq_len, dims).
    return pe_flat.reshape(1, seq_len, dims)


# ----------------------------------- main ----------------------------------- #
if __name__ == "__main__":
    key = jax.random.PRNGKey(0)

    def reference(S, D):
        position = np.arange(S, dtype=np.float32)[:, None]
        div_term = np.exp(np.arange(0, D, 2, dtype=np.float32) * -(math.log(10000.0) / D))
        ref = np.zeros((S, D), np.float32)
        ref[:, 0::2] = np.sin(position * div_term)
        ref[:, 1::2] = np.cos(position * div_term)
        return ref[None]

    # Primary small example (B=2, S=8, D=32): lane-dense packed path (L=128).
    B, S, D = 2, 8, 32
    x = jax.random.normal(key, (B, S, D), jnp.float32)
    out = jax.block_until_ready(positional_encoding(x, dims=D, max_len=5000))
    assert out.shape == (1, S, D)
    assert bool(jnp.all(jnp.isfinite(out)))
    np.testing.assert_allclose(np.asarray(out), reference(S, D), rtol=1e-4, atol=1e-4)

    # Second check: multi-tile grid with a clipped (partial) edge block.
    S2 = 60                                 # rows_total = 15 -> tile 8, grid 2
    x2 = jax.random.normal(key, (B, S2, D), jnp.float32)
    out2 = jax.block_until_ready(positional_encoding(x2, dims=D, max_len=5000))
    assert out2.shape == (1, S2, D)
    np.testing.assert_allclose(np.asarray(out2), reference(S2, D), rtol=1e-4, atol=1e-4)

    print("KERNEL_OK")
</pallas_src>

<mosaic_0001>
module attributes {stable_mosaic.version = 11 : i64} {
  func.func @_pe_kernel(%arg0: i32, %arg1: memref<1x128xf32, #tpu.memory_space<vmem>>, %arg2: memref<1x128xf32, #tpu.memory_space<vmem>>, %arg3: memref<2x128xf32, #tpu.memory_space<vmem>>) attributes {dimension_semantics = [#tpu.dimension_semantics<parallel>], iteration_bounds = array<i64: 1>, scalar_prefetch = 0 : i64, scratch_operands = 0 : i64, tpu.core_type = #tpu.core_type<tc>, window_params = [{pipeline_mode = #tpu.pipeline_mode<synchronous>, transform_indices = @transform_0, window_bounds = array<i64: 1, 128>}, {pipeline_mode = #tpu.pipeline_mode<synchronous>, transform_indices = @transform_1, window_bounds = array<i64: 1, 128>}, {transform_indices = @transform_2, window_bounds = array<i64: 2, 128>}]} {
    %0 = tpu.iota {dimensions = array<i32: 0>} : vector<2x128xi32>
    %c2_i32 = arith.constant 2 : i32
    %1 = arith.muli %arg0, %c2_i32 : i32
    %2 = vector.broadcast %1 : i32 to vector<2x128xi32>
    %3 = arith.addi %0, %2 : vector<2x128xi32>
    %4 = arith.sitofp %3 : vector<2x128xi32> to vector<2x128xf32>
    %c0 = arith.constant 0 : index
    %c0_0 = arith.constant 0 : index
    %5 = vector.load %arg1[%c0, %c0_0] : memref<1x128xf32, #tpu.memory_space<vmem>>, vector<1x128xf32>
    %6 = vector.broadcast %5 : vector<1x128xf32> to vector<2x128xf32>
    %7 = arith.mulf %4, %6 : vector<2x128xf32>
    %c0_1 = arith.constant 0 : index
    %c0_2 = arith.constant 0 : index
    %8 = vector.load %arg2[%c0_1, %c0_2] : memref<1x128xf32, #tpu.memory_space<vmem>>, vector<1x128xf32>
    %9 = vector.broadcast %8 : vector<1x128xf32> to vector<2x128xf32>
    %10 = arith.addf %7, %9 : vector<2x128xf32>
    %11 = math.sin %10 : vector<2x128xf32>
    %c0_3 = arith.constant 0 : index
    %c0_4 = arith.constant 0 : index
    %12 = vector.load %arg3[%c0_3, %c0_4] : memref<2x128xf32, #tpu.memory_space<vmem>>, vector<2x128xf32>
    tpu.vector_store %arg3[%c0_3, %c0_4], %11 {strides = array<i32>} : memref<2x128xf32, #tpu.memory_space<vmem>>, vector<2x128xf32>,
    return
  }
  func.func @transform_0(%arg0: i32) -> (i32, i32) {
    %c0_i32 = arith.constant 0 : i32
    %c0_i32_0 = arith.constant 0 : i32
    %c0_i32_1 = arith.constant 0 : i32
    return %c0_i32, %c0_i32_0 : i32, i32
  }
  func.func @transform_1(%arg0: i32) -> (i32, i32) {
    %c0_i32 = arith.constant 0 : i32
    %c0_i32_0 = arith.constant 0 : i32
    %c0_i32_1 = arith.constant 0 : i32
    return %c0_i32, %c0_i32_0 : i32, i32
  }
  func.func @transform_2(%arg0: i32) -> (i32, i32) {
    %c0_i32 = arith.constant 0 : i32
    %c0_i32_0 = arith.constant 0 : i32
    return %arg0, %c0_i32 : i32, i32
  }
}

</mosaic_0001>

<bundles_post_ra>
// kernel: tpu_custom_call.1
= control target key start
LH: loop header
LB: loop body
LE: loop exit
PB: predicated region body
PF: predicated region fallthrough
CT: control target
= control target key end

     0   :  { %7 = vsyncpa [#allocation3], 0  ;;  %s307_s0 = inlined_call_operand.hbm [shape: f32[1,128], index: 0, kind: input, shape index: {}]   ;;  %s308_s1 = inlined_call_operand.vmem [shape: f32[1,128], index: 1, kind: input, shape index: {}]   ;;  %s309_s2 = inlined_call_operand.hbm [shape: f32[2,128], index: 2, kind: output, shape index: {}]  }
   0x1   :  { %8 = vsyncpa [#allocation4], 0  ;;  %s236_s9 = smov [#allocation2]   ;;  %s188_s13 = scalar_lea.hbm %s307_s0, 16 }
   0x2   :  { %s15_s10 = sshll.u32 %s236_s9, 4  ;;  %p189_p0 = scmp.ne.s32.totalorder %s307_s0, %s188_s13  ;;  %s16_s10 = int_to_ptr.vmem [resolvable:$true] %s15_s10 }
   0x3   :  { %p192_p1 = scmp.lt.u32.totalorder %s188_s13, %s307_s0 }
   0x5   :  { %p194_p2 = pnand %p192_p1, %p189_p0 }
   0x7   :  { %197 = shalt.err (!%p194_p2)
}
   0x8   :  { %s198_s18 = scalar_lea.vmem %s16_s10, 16  ;;  %s202_s19 = scalar_lea.vmem %s16_s10, 32 }
   0x9   :  { %p199_p3 = scmp.ne.s32.totalorder %s16_s10, %s198_s18  ;;  %p203_p4 = scmp.lt.s32.totalorder %s16_s10, %s16_s10 }
   0xa   :  { %p204_p5 = scmp.lt.s32.totalorder %s202_s19, %s198_s18 }
   0xc   :  { %p205_p6 = por %p204_p5, %p203_p4 }
   0xe   :  { %p206_p7 = pnand %p205_p6, %p199_p3 }
  0x10   :  { %209 = shalt.err (!%p206_p7)
}
  0x11   :  { %18 = dma.hbm_to_vmem [thread:$0]  %s307_s0, 16, %s16_s10, [#allocation3]  }
  0x12   :  { %232 = dma.done.wait [#allocation3], 16  }
  0x13   :  { %233 = vsyncadd [#allocation3], 4294967280  ;;  %v24_v0 = vlaneseq  ;;  %v166_v3 = vld [vmem:[#allocation2] ss:$0 sm:$0xff]  ;;  %v237_v18 = vmov 683565275  }
  0x14   :  { %v167_v4 = vld [vmem:[%s308_s1] ss:$0 sm:$0xff]  ;;  %v238_v20 = vmov 2475754826   ;;  %v239_v22 = vmov 2131351028  }
  0x15   :  { %v25_v1 = vshrl.u32 %v24_v0, 7  ;;  %v240_v24 = vmov 2102212464   ;;  %v241_v26 = vmov 920167782   ;;  %s243_s0 = smov [#allocation5]  }
  0x16   :  { %v242_v33 = vmov 1326507024   ;;  %s157_s1 = sshll.u32 %s243_s0, 4  ;;  %s158_s1 = int_to_ptr.vmem [resolvable:$true] %s157_s1 }
  0x17   :  { %v29_v2 = vcvt.s32.f32 %v25_v1  ;;  %s210_s24 = scalar_lea.vmem %s158_s1, 32  ;;  %p215_p9 = scmp.lt.s32.totalorder %s158_s1, %s158_s1 }
  0x18   :  { %p211_p8 = scmp.ne.s32.totalorder %s158_s1, %s210_s24  ;;  %p216_p10 = scmp.lt.s32.totalorder %s210_s24, %s210_s24 }
  0x19   :  { %v37_v5 = vmul.f32 %v166_v3, %v29_v2 }
  0x1a   :  { %p217_p11 = por %p216_p10, %p215_p9 }
  0x1b   :  { %v274_v6 = vadd.f32 %v167_v4, %v37_v5 }
  0x1c   :  { %p218_p12 = pnand %p217_p11, %p211_p8 }
  0x1d   :  { %v49_v7 = vand.u32 2139095040, %v274_v6  ;;  %v46_v9 = vand.u32 2147483647, %v274_v6  ;;  %vm48_vm7 = vcmp.lt.s32.totalorder %v274_v6, 0  ;;  %vm138_vm12 = vweird.f32 %v274_v6 }
  0x1f   :  { %v50_v8 = vshrl.u32 %v49_v7, 23  ;;  %v53_v12 = vand.u32 8388607, %v46_v9  ;;  %vm47_vm8 = vcmp.le.f32.partialorder %v46_v9, 0.7853982 }
  0x21   :  { %v168_v10 = vadd.s32 4294967169, %v50_v8  ;;  %v54_v15 = vor.u32 8388608, %v53_v12 }
  0x23   :  { %v56_v11 = vadd.s32 1, %v168_v10  ;;  %v94_v35 = vshll.u32 %v54_v15, 8 }
  0x25   :  { %vm57_vm0 = vcmp.gt.s32.totalorder %v56_v11, 0 }
  0x26   :  { %v58_v13 = vsel %vm57_vm0, %v56_v11, 0 }
  0x27   :  { %v60_v14 = vand.u32 31, %v58_v13  ;;  %v59_v16 = vshrl.u32 %v58_v13, 5 }
  0x29   :  { %v61_v17 = vsub.s32 32, %v60_v14  ;;  %v63_v19 = vshll.u32 %v237_v18, %v60_v14  ;;  %v66_v21 = vshll.u32 %v238_v20, %v60_v14  ;;  %v69_v23 = vshll.u32 %v239_v22, %v60_v14 }
  0x2a   :  { %v72_v25 = vshll.u32 %v240_v24, %v60_v14  ;;  %v75_v27 = vshll.u32 %v241_v26, %v60_v14  ;;  %vm78_vm1 = vcmp.lt.s32.totalorder %v59_v16, 1  ;;  %vm81_vm2 = vcmp.lt.s32.totalorder %v59_v16, 4 }
  0x2b   :  { %v62_v28 = vshrl.u32 %v237_v18, %v61_v17  ;;  %v64_v29 = vshrl.u32 %v238_v20, %v61_v17  ;;  %v67_v30 = vshrl.u32 %v239_v22, %v61_v17  ;;  %v70_v31 = vshrl.u32 %v240_v24, %v61_v17 }
  0x2c   :  { %v73_v32 = vshrl.u32 %v241_v26, %v61_v17  ;;  %v76_v34 = vshrl.u32 %v242_v33, %v61_v17  ;;  %vm79_vm3 = vcmp.lt.s32.totalorder %v59_v16, 2  ;;  %vm80_vm4 = vcmp.lt.s32.totalorder %v59_v16, 3 }
  0x2d   :  { %v65_v36 = vor.u32 %v64_v29, %v63_v19  ;;  %v68_v37 = vor.u32 %v67_v30, %v66_v21  ;;  %v71_v38 = vor.u32 %v70_v31, %v69_v23 }
  0x2e   :  { %v74_v39 = vor.u32 %v73_v32, %v72_v25  ;;  %v77_v40 = vor.u32 %v76_v34, %v75_v27 }
  0x2f   :  { %v82_v41 = vsel %vm78_vm1, %v62_v28, %v65_v36  ;;  %v83_v42 = vsel %vm81_vm2, %v71_v38, 2102212464  ;;  %v86_v43 = vsel %vm78_vm1, %v65_v36, %v68_v37  ;;  %v90_v44 = vsel %vm78_vm1, %v68_v37, %v71_v38 }
  0x30   :  { %v84_v45 = vsel %vm80_vm4, %v68_v37, %v83_v42  ;;  %v87_v46 = vsel %vm81_vm2, %v74_v39, 920167782  ;;  %v91_v47 = vsel %vm81_vm2, %v77_v40, 1326507024 }
  0x31   :  { %v88_v48 = vsel %vm80_vm4, %v71_v38, %v87_v46  ;;  %v92_v49 = vsel %vm80_vm4, %v74_v39, %v91_v47  ;;  %v85_v50 = vsel %vm79_vm3, %v82_v41, %v84_v45 }
  0x32   :  { %v89_v51 = vsel %vm79_vm3, %v86_v43, %v88_v48  ;;  %v93_v52 = vsel %vm79_vm3, %v90_v44, %v92_v49  ;;  %v101_v57 = vmul.u32 %v94_v35, %v85_v50 }
  0x33   :  { %v280_v53 = vmul.u32.u64.low %v94_v35, %v93_v52  ;;  %v281_v54 = vmul.u32.u64.high %v94_v35, %v93_v52, %v280_v53  ;;  %v283_v55 = vmul.u32.u64.low %v94_v35, %v89_v51  ;;  %v284_v56 = vmul.u32.u64.high %v94_v35, %v89_v51, %v283_v55 }
  0x35   :  { %vm103_vm5 = vc.u32 %v281_v54, %v283_v55  ;;  %v104_v58 = vadd.s32 1, %v284_v56  ;;  %v102_v5 = vadd.s32 %v283_v55, %v281_v54 }
  0x37   :  { %v105_v59 = vsel %vm103_vm5, %v104_v58, %v284_v56 }
  0x38   :  { %v106_v60 = vadd.s32 %v105_v59, %v101_v57 }
  0x3a   :  { %v107_v61 = vadd.s32 536870912, %v106_v60 }
  0x3c   :  { %v108_v62 = vshrl.u32 %v107_v61, 30 }
  0x3e   :  { %v109_v63 = vshll.u32 %v108_v62, 30  ;;  %v132_v19 = vsub.s32 4, %v108_v62 }
  0x40   :  { %v110_v0 = vsub.s32 %v106_v60, %v109_v63  ;;  %v133_v22 = vsel %vm48_vm7, %v132_v19, %v108_v62 }
  0x41   :  { %v135_v25 = vsel %vm47_vm8, 0, %v133_v22 }
  0x42   :  { %v112_v1 = vsub.s32 0, %v110_v0  ;;  %v139_v26 = vadd.s32 3, %v135_v25 }
  0x44   :  { %v169_v2 = vmin.u32 %v112_v1, %v110_v0  ;;  %v140_v27 = vand.u32 3, %v139_v26 }
  0x46   :  { %v114_v3 = vclz %v169_v2  ;;  %vm145_vm9 = vcmp.eq.s32.totalorder %v140_v27, 2  ;;  %vm142_vm10 = vcmp.eq.s32.totalorder %v140_v27, 0  ;;  %vm141_vm11 = vcmp.lt.s32.totalorder %v140_v27, 2 }
  0x48   :  { %v170_v4 = vadd.s32 4294967294, %v114_v3 }
  0x4a   :  { %vm171_vm6 = vcmp.lt.s32.totalorder %v170_v4, 0 }
  0x4b   :  { %v117_v7 = vsel %vm171_vm6, 0, %v170_v4 }
  0x4c   :  { %v118_v8 = vsub.s32 32, %v117_v7  ;;  %v119_v10 = vshll.u32 %v110_v0, %v117_v7  ;;  %v122_v11 = vsub.s32 4294967266, %v117_v7 }
  0x4e   :  { %v120_v12 = vshrl.u32 %v102_v5, %v118_v8  ;;  %v123_v13 = vadd.s32 127, %v122_v11 }
  0x50   :  { %v121_v14 = vor.u32 %v120_v12, %v119_v10  ;;  %v124_v15 = vshll.u32 %v123_v13, 23 }
  0x52   :  { %v125_v16 = vor.u32 4788187, %v124_v15  ;;  %v128_v17 = vcvt.s32.f32 %v121_v14 }
  0x54   :  { %v126_v18 = vand.u32 2147483647, %v125_v16 }
  0x56   :  { %v129_v20 = vmul.f32 %v128_v17, %v126_v18 }
  0x58   :  { %v130_v21 = vxor.u32 2147483648, %v129_v20 }
  0x5a   :  { %v131_v23 = vsel %vm48_vm7, %v130_v21, %v129_v20 }
  0x5b   :  { %v134_v24 = vsel %vm47_vm8, %v274_v6, %v131_v23 }
  0x5c   :  { %184 = vcosq.f32 %v134_v24 }
  0x5d   :  { %186 = vsinq.f32 %v134_v24 }
  0x66   :  { %v185_v28 = vpop.eup %184 }
  0x67   :  { %v187_v29 = vpop.eup %186  ;;  %v146_v30 = vxor.u32 2147483648, %v185_v28 }
  0x68   :  { %v143_v31 = vxor.u32 2147483648, %v187_v29 }
  0x69   :  { %v147_v9 = vsel %vm145_vm9, %v146_v30, %v187_v29 }
  0x6a   :  { %v144_v32 = vsel %vm142_vm10, %v185_v28, %v143_v31 }
  0x6b   :  { %v148_v33 = vsel %vm141_vm11, %v144_v32, %v147_v9 }
  0x6c   :  { %v149_v34 = vsel %vm138_vm12, nan, %v148_v33 }
  0x6d   :  { %150 = vst [vmem:[#allocation5] sm:$0x3] %v149_v34 }
  0x6e   :  { %221 = shalt.err (!%p218_p12)
}
  0x6f   :  { %s222_s27 = scalar_lea.hbm %s309_s2, 32 }
  0x70   :  { %p223_p13 = scmp.ne.s32.totalorder %s309_s2, %s222_s27  ;;  %p226_p0 = scmp.lt.u32.totalorder %s222_s27, %s309_s2 }
  0x72   :  { %p228_p1 = pnand %p226_p0, %p223_p13 }
  0x74   :  { %231 = shalt.err (!%p228_p1)
}
  0x75   :  { %160 = dma.vmem_to_hbm [thread:$0]  %s158_s1, 32, %s309_s2, [#allocation4]  }
  0x76   :  { %234 = dma.done.wait [#allocation4], 32  }
  0x77   :  { %235 = vsyncadd [#allocation4], 4294967264 }
  0x78   :  { %164 = vsyncpa [#allocation3], 1 }
  0x79   :  { %165 = vsyncpa [#allocation4], 1 }

</bundles_post_ra>
